<compile_context>
chip_gen: v7x
topology: tpu7x:2x2x1
jax: 0.10.0
libtpu: 0.0.40
codegen_flags: <defaults>
</compile_context>

<pallas_src>
import functools

import jax
import jax.numpy as jnp
from jax import lax
from jax.experimental import pallas as pl
from jax.experimental.pallas import tpu as pltpu

N_OBS = 6      # the module hard-codes x[:6] as the observation
FP = 128       # lane padding for hidden/output feature dims (<= 128)
TB_MAX = 1024  # max batch rows per grid step


def _pick_tb(batch):
    """Largest power-of-two tile in [128, TB_MAX] that still gives >= 2 grid
    steps when possible (keeps both v7x TensorCores busy via "parallel")."""
    tb = TB_MAX
    while tb > 128 and batch < 2 * tb:
        tb //= 2
    return tb


def _mlp_kernel(x_ref, w1_ref, w_ref, b_ref, o_ref):
    x = x_ref[...]                                            # (TB, d) f32, d = input_size

    # --- per-row observation normalization over the first N_OBS lanes ------
    lane = lax.broadcasted_iota(jnp.int32, x.shape, 1)
    obs_mask = lane < N_OBS
    n = jnp.float32(N_OBS)

    mean = jnp.sum(jnp.where(obs_mask, x, 0.0), axis=-1, keepdims=True) / n
    centered = x - mean
    var = jnp.sum(jnp.where(obs_mask, centered * centered, 0.0),
                  axis=-1, keepdims=True) / (n - 1.0)          # torch.std: ddof=1
    inv_std = lax.rsqrt(var)                                    # EUP slot, ~free
    # lanes [0,6): normalized obs; lanes [6,d): action (unchanged).
    # NOTE: faithful to PyTorch -- a row with constant observation gives inf/NaN,
    # and so do zero-padded batch rows (they are sliced off by the wrapper).
    h = jnp.where(obs_mask, centered * inv_std, x)

    # --- MLP hot path: bf16 MXU matmuls with f32 accumulation ---------------
    # layer 1: (TB, d) @ (d, FP)
    h = jnp.dot(h.astype(jnp.bfloat16), w1_ref[...],
                preferred_element_type=jnp.float32)
    h = jnp.maximum(h + b_ref[0:1, :], 0.0)
    # layers 2-3: (TB, FP) @ (FP, FP), ReLU
    for l in range(2):
        w = w_ref[l * FP:(l + 1) * FP, :]                       # static slice: free view
        h = jnp.dot(h.astype(jnp.bfloat16), w, preferred_element_type=jnp.float32)
        h = jnp.maximum(h + b_ref[l + 1:l + 2, :], 0.0)
    # layer 4 (output), then store only the real out_size lanes
    w = w_ref[2 * FP:3 * FP, :]
    out = jnp.dot(h.astype(jnp.bfloat16), w,
                  preferred_element_type=jnp.float32) + b_ref[3:4, :]
    o_ref[...] = out[:, :o_ref.shape[-1]]


def pack_params(params):
    """One-time packing of PyTorch-layout (out,in) params for the kernel.

    Returns:
      w1p   : (input_size, FP) bf16 -- W1^T, columns zero-padded to FP.
      w_slab: (3*FP, FP)       bf16 -- W2^T, W3^T, W4^T zero-padded to (FP,FP),
                                       stacked along rows.
      b_slab: (8, FP)          f32  -- bias l in row l-1, zero-padded.
    Call once at init; reuse across every CEM evaluation.
    """
    w1 = jnp.asarray(params["w1"], jnp.float32).T               # (in, hidden)
    d, hid = w1.shape
    assert hid <= FP
    w1p = jnp.zeros((d, FP), jnp.float32).at[:, :hid].set(w1).astype(jnp.bfloat16)

    ws = []
    for i in (2, 3, 4):
        w = jnp.asarray(params[f"w{i}"], jnp.float32).T         # (in, out)
        fin, fout = w.shape
        assert fin <= FP and fout <= FP
        ws.append(jnp.zeros((FP, FP), jnp.float32).at[:fin, :fout].set(w))
    w_slab = jnp.concatenate(ws, axis=0).astype(jnp.bfloat16)   # (3*FP, FP)

    b_slab = jnp.zeros((8, FP), jnp.float32)
    for i in (1, 2, 3, 4):
        b = jnp.asarray(params[f"b{i}"], jnp.float32)
        b_slab = b_slab.at[i - 1, :b.shape[0]].set(b)
    return w1p, w_slab, b_slab


@functools.partial(jax.jit, static_argnames=("out_size",))
def neural_network_model_forward(x_batch, w1p, w_slab, b_slab, *, out_size):
    """Apply the module row-wise to a CEM population.

    x_batch: (B, input_size) float32.  Returns (B, out_size) float32.
    """
    B, d = x_batch.shape
    assert N_OBS <= d <= FP and out_size <= FP

    TB = _pick_tb(B)
    Bp = pl.cdiv(B, TB) * TB
    xp = x_batch.astype(jnp.float32)
    if Bp != B:
        # Row-only padding (cheap).  Padded all-zero rows produce NaNs in the
        # padded output region (std == 0), but those rows are sliced off below.
        xp = jnp.pad(xp, ((0, Bp - B), (0, 0)))

    out = pl.pallas_call(
        _mlp_kernel,
        out_shape=jax.ShapeDtypeStruct((Bp, out_size), jnp.float32),
        grid_spec=pltpu.PrefetchScalarGridSpec(
            num_scalar_prefetch=0,
            grid=(Bp // TB,),
            in_specs=[
                pl.BlockSpec((TB, d), lambda i: (i, 0)),          # x tile (narrow lanes)
                pl.BlockSpec((d, FP), lambda i: (0, 0)),          # W1^T (resident)
                pl.BlockSpec((3 * FP, FP), lambda i: (0, 0)),     # W2..W4 slab (resident)
                pl.BlockSpec((8, FP), lambda i: (0, 0)),          # bias slab (resident)
            ],
            out_specs=pl.BlockSpec((TB, out_size), lambda i: (i, 0)),
        ),
        compiler_params=pltpu.CompilerParams(
            dimension_semantics=("parallel",)),                   # megacore / v7x 2-TC
    )(xp, w1p, w_slab, b_slab)
    return out[:B]


def _init_params(key, input_size, hidden_size, output_size):
    """Deterministic synthetic parameters in PyTorch nn.Linear layout (out, in)."""
    dims = [(hidden_size, input_size), (hidden_size, hidden_size),
            (hidden_size, hidden_size), (output_size, hidden_size)]
    params = {}
    for i, (fan_out, fan_in) in enumerate(dims, start=1):
        key, kw, kb = jax.random.split(key, 3)
        bound = 1.0 / jnp.sqrt(jnp.float32(fan_in))
        params[f"w{i}"] = jax.random.uniform(
            kw, (fan_out, fan_in), jnp.float32, -bound, bound)
        params[f"b{i}"] = jax.random.uniform(
            kb, (fan_out,), jnp.float32, -bound, bound)
    return params


def _reference_forward(x_batch, params, weight_dtype=jnp.float32):
    """Pure-JAX reference mirroring the PyTorch module (batched).

    weight_dtype=bf16 mirrors the kernel's bf16-weight / f32-accumulate matmuls
    for a tight check; weight_dtype=f32 is the exact PyTorch-semantics reference.
    """
    obs = x_batch[:, :N_OBS]
    act = x_batch[:, N_OBS:]
    obs = (obs - obs.mean(axis=-1, keepdims=True)) / obs.std(axis=-1, keepdims=True, ddof=1)
    h = jnp.concatenate([obs, act], axis=-1)
    for i in (1, 2, 3):
        w = params[f"w{i}"].T.astype(weight_dtype)
        h = jnp.maximum(
            jnp.dot(h.astype(weight_dtype), w, preferred_element_type=jnp.float32)
            + params[f"b{i}"], 0.0)
    w = params["w4"].T.astype(weight_dtype)
    return (jnp.dot(h.astype(weight_dtype), w, preferred_element_type=jnp.float32)
            + params["b4"])


if __name__ == "__main__":
    input_size, hidden_size, output_size = 8, 32, 4   # 6 obs dims + 2 action dims
    batch = 256                                       # CEM population (2 grid steps of 128)

    key = jax.random.PRNGKey(0)
    key, kx = jax.random.split(key)
    x = jax.random.normal(kx, (batch, input_size), jnp.float32)
    params = _init_params(key, input_size, hidden_size, output_size)

    # Pack/transpose/pad parameters ONCE (constant across CEM evaluations).
    w1p, w_slab, b_slab = pack_params(params)

    y = neural_network_model_forward(x, w1p, w_slab, b_slab, out_size=output_size)
    y = jax.block_until_ready(y)
    assert y.shape == (batch, output_size)

    # Tight check vs. a reference that mirrors the kernel's bf16 matmuls.
    y_ref_bf16 = _reference_forward(x, params, weight_dtype=jnp.bfloat16)
    assert jnp.allclose(y, y_ref_bf16, atol=2e-3, rtol=2e-3), \
        float(jnp.max(jnp.abs(y - y_ref_bf16)))
    # Loose check vs. the exact f32 PyTorch-semantics reference (bf16 weights).
    y_ref_f32 = _reference_forward(x, params, weight_dtype=jnp.float32)
    assert jnp.allclose(y, y_ref_f32, atol=5e-2, rtol=5e-2), \
        float(jnp.max(jnp.abs(y - y_ref_f32)))

    print("KERNEL_OK")
</pallas_src>

<mosaic_0001>
module attributes {stable_mosaic.version = 11 : i64} {
  func.func @_mlp_kernel(%arg0: i32, %arg1: memref<128x8xf32, #tpu.memory_space<vmem>>, %arg2: memref<8x128xbf16, #tpu.memory_space<vmem>>, %arg3: memref<384x128xbf16, #tpu.memory_space<vmem>>, %arg4: memref<8x128xf32, #tpu.memory_space<vmem>>, %arg5: memref<128x4xf32, #tpu.memory_space<vmem>>) attributes {dimension_semantics = [#tpu.dimension_semantics<parallel>], iteration_bounds = array<i64: 2>, scalar_prefetch = 0 : i64, scratch_operands = 0 : i64, tpu.core_type = #tpu.core_type<tc>, window_params = [{transform_indices = @transform_0, window_bounds = array<i64: 128, 8>}, {pipeline_mode = #tpu.pipeline_mode<synchronous>, transform_indices = @transform_1, window_bounds = array<i64: 8, 128>}, {pipeline_mode = #tpu.pipeline_mode<synchronous>, transform_indices = @transform_2, window_bounds = array<i64: 384, 128>}, {pipeline_mode = #tpu.pipeline_mode<synchronous>, transform_indices = @transform_3, window_bounds = array<i64: 8, 128>}, {transform_indices = @transform_4, window_bounds = array<i64: 128, 4>}]} {
    %c0 = arith.constant 0 : index
    %c0_0 = arith.constant 0 : index
    %0 = vector.load %arg1[%c0, %c0_0] : memref<128x8xf32, #tpu.memory_space<vmem>>, vector<128x8xf32>
    %1 = tpu.iota {dimensions = array<i32: 1>} : vector<128x8xi32>
    %c6_i32 = arith.constant 6 : i32
    %2 = vector.broadcast %c6_i32 : i32 to vector<128x8xi32>
    %3 = arith.cmpi slt, %1, %2 : vector<128x8xi32>
    %cst = arith.constant 0.000000e+00 : f32
    %4 = vector.broadcast %cst : f32 to vector<128x8xf32>
    %5 = arith.select %3, %0, %4 : vector<128x8xi1>, vector<128x8xf32>
    %cst_1 = arith.constant dense<0.000000e+00> : vector<128xf32>
    %6 = vector.multi_reduction <add>, %5, %cst_1 [1] : vector<128x8xf32> to vector<128xf32>
    %7 = vector.shape_cast %6 : vector<128xf32> to vector<128x1xf32>
    %cst_2 = arith.constant 6.000000e+00 : f32
    %8 = vector.broadcast %cst_2 : f32 to vector<128x1xf32>
    %9 = arith.divf %7, %8 : vector<128x1xf32>
    %10 = vector.broadcast %9 : vector<128x1xf32> to vector<128x8xf32>
    %11 = arith.subf %0, %10 : vector<128x8xf32>
    %12 = arith.mulf %11, %11 : vector<128x8xf32>
    %cst_3 = arith.constant 0.000000e+00 : f32
    %13 = vector.broadcast %cst_3 : f32 to vector<128x8xf32>
    %14 = arith.select %3, %12, %13 : vector<128x8xi1>, vector<128x8xf32>
    %cst_4 = arith.constant dense<0.000000e+00> : vector<128xf32>
    %15 = vector.multi_reduction <add>, %14, %cst_4 [1] : vector<128x8xf32> to vector<128xf32>
    %16 = vector.shape_cast %15 : vector<128xf32> to vector<128x1xf32>
    %cst_5 = arith.constant 6.000000e+00 : f32
    %cst_6 = arith.constant 1.000000e+00 : f32
    %17 = arith.subf %cst_5, %cst_6 : f32
    %18 = vector.broadcast %17 : f32 to vector<128x1xf32>
    %19 = arith.divf %16, %18 : vector<128x1xf32>
    %20 = math.rsqrt %19 : vector<128x1xf32>
    %21 = vector.broadcast %20 : vector<128x1xf32> to vector<128x8xf32>
    %22 = arith.mulf %11, %21 : vector<128x8xf32>
    %23 = arith.select %3, %22, %0 : vector<128x8xi1>, vector<128x8xf32>
    %24 = arith.truncf %23 : vector<128x8xf32> to vector<128x8xbf16>
    %c0_7 = arith.constant 0 : index
    %c0_8 = arith.constant 0 : index
    %25 = vector.load %arg2[%c0_7, %c0_8] : memref<8x128xbf16, #tpu.memory_space<vmem>>, vector<8x128xbf16>
    %cst_9 = arith.constant dense<0.000000e+00> : vector<128x128xf32>
    %26 = tpu.matmul %24, %25, %cst_9 {dimension_numbers = #tpu.dot_dimension_numbers<[1], [0], [0], [1], [0, 0, 1, 1], [], []>} : vector<128x8xbf16>, vector<8x128xbf16>, vector<128x128xf32> -> vector<128x128xf32>
    %c0_10 = arith.constant 0 : index
    %c0_11 = arith.constant 0 : index
    %27 = vector.load %arg4[%c0_10, %c0_11] : memref<8x128xf32, #tpu.memory_space<vmem>>, vector<1x128xf32>
    %28 = vector.broadcast %27 : vector<1x128xf32> to vector<128x128xf32>
    %29 = arith.addf %26, %28 : vector<128x128xf32>
    %cst_12 = arith.constant 0.000000e+00 : f32
    %30 = vector.broadcast %cst_12 : f32 to vector<128x128xf32>
    %31 = arith.maximumf %29, %30 : vector<128x128xf32>
    %c0_13 = arith.constant 0 : index
    %c0_14 = arith.constant 0 : index
    %32 = vector.load %arg3[%c0_13, %c0_14] : memref<384x128xbf16, #tpu.memory_space<vmem>>, vector<128x128xbf16>
    %33 = arith.truncf %31 : vector<128x128xf32> to vector<128x128xbf16>
    %cst_15 = arith.constant dense<0.000000e+00> : vector<128x128xf32>
    %34 = tpu.matmul %33, %32, %cst_15 {dimension_numbers = #tpu.dot_dimension_numbers<[1], [0], [0], [1], [0, 0, 1, 1], [], []>} : vector<128x128xbf16>, vector<128x128xbf16>, vector<128x128xf32> -> vector<128x128xf32>
    %c1 = arith.constant 1 : index
    %c0_16 = arith.constant 0 : index
    %35 = vector.load %arg4[%c1, %c0_16] : memref<8x128xf32, #tpu.memory_space<vmem>>, vector<1x128xf32>
    %36 = vector.broadcast %35 : vector<1x128xf32> to vector<128x128xf32>
    %37 = arith.addf %34, %36 : vector<128x128xf32>
    %cst_17 = arith.constant 0.000000e+00 : f32
    %38 = vector.broadcast %cst_17 : f32 to vector<128x128xf32>
    %39 = arith.maximumf %37, %38 : vector<128x128xf32>
    %c128 = arith.constant 128 : index
    %c0_18 = arith.constant 0 : index
    %40 = vector.load %arg3[%c128, %c0_18] : memref<384x128xbf16, #tpu.memory_space<vmem>>, vector<128x128xbf16>
    %41 = arith.truncf %39 : vector<128x128xf32> to vector<128x128xbf16>
    %cst_19 = arith.constant dense<0.000000e+00> : vector<128x128xf32>
    %42 = tpu.matmul %41, %40, %cst_19 {dimension_numbers = #tpu.dot_dimension_numbers<[1], [0], [0], [1], [0, 0, 1, 1], [], []>} : vector<128x128xbf16>, vector<128x128xbf16>, vector<128x128xf32> -> vector<128x128xf32>
    %c2 = arith.constant 2 : index
    %c0_20 = arith.constant 0 : index
    %43 = vector.load %arg4[%c2, %c0_20] : memref<8x128xf32, #tpu.memory_space<vmem>>, vector<1x128xf32>
    %44 = vector.broadcast %43 : vector<1x128xf32> to vector<128x128xf32>
    %45 = arith.addf %42, %44 : vector<128x128xf32>
    %cst_21 = arith.constant 0.000000e+00 : f32
    %46 = vector.broadcast %cst_21 : f32 to vector<128x128xf32>
    %47 = arith.maximumf %45, %46 : vector<128x128xf32>
    %c256 = arith.constant 256 : index
    %c0_22 = arith.constant 0 : index
    %48 = vector.load %arg3[%c256, %c0_22] : memref<384x128xbf16, #tpu.memory_space<vmem>>, vector<128x128xbf16>
    %49 = arith.truncf %47 : vector<128x128xf32> to vector<128x128xbf16>
    %cst_23 = arith.constant dense<0.000000e+00> : vector<128x128xf32>
    %50 = tpu.matmul %49, %48, %cst_23 {dimension_numbers = #tpu.dot_dimension_numbers<[1], [0], [0], [1], [0, 0, 1, 1], [], []>} : vector<128x128xbf16>, vector<128x128xbf16>, vector<128x128xf32> -> vector<128x128xf32>
    %c3 = arith.constant 3 : index
    %c0_24 = arith.constant 0 : index
    %51 = vector.load %arg4[%c3, %c0_24] : memref<8x128xf32, #tpu.memory_space<vmem>>, vector<1x128xf32>
    %52 = vector.broadcast %51 : vector<1x128xf32> to vector<128x128xf32>
    %53 = arith.addf %50, %52 : vector<128x128xf32>
    %54 = vector.extract_strided_slice %53 {offsets = [0, 0], sizes = [128, 4], strides = [1, 1]} : vector<128x128xf32> to vector<128x4xf32>
    %c0_25 = arith.constant 0 : index
    %c0_26 = arith.constant 0 : index
    %55 = vector.load %arg5[%c0_25, %c0_26] : memref<128x4xf32, #tpu.memory_space<vmem>>, vector<128x4xf32>
    tpu.vector_store %arg5[%c0_25, %c0_26], %54 {strides = array<i32>} : memref<128x4xf32, #tpu.memory_space<vmem>>, vector<128x4xf32>,
    return
  }
  func.func @transform_0(%arg0: i32) -> (i32, i32) {
    %c0_i32 = arith.constant 0 : i32
    %c0_i32_0 = arith.constant 0 : i32
    return %arg0, %c0_i32 : i32, i32
  }
  func.func @transform_1(%arg0: i32) -> (i32, i32) {
    %c0_i32 = arith.constant 0 : i32
    %c0_i32_0 = arith.constant 0 : i32
    %c0_i32_1 = arith.constant 0 : i32
    return %c0_i32, %c0_i32_0 : i32, i32
  }
  func.func @transform_2(%arg0: i32) -> (i32, i32) {
    %c0_i32 = arith.constant 0 : i32
    %c0_i32_0 = arith.constant 0 : i32
    %c0_i32_1 = arith.constant 0 : i32
    return %c0_i32, %c0_i32_0 : i32, i32
  }
  func.func @transform_3(%arg0: i32) -> (i32, i32) {
    %c0_i32 = arith.constant 0 : i32
    %c0_i32_0 = arith.constant 0 : i32
    %c0_i32_1 = arith.constant 0 : i32
    return %c0_i32, %c0_i32_0 : i32, i32
  }
  func.func @transform_4(%arg0: i32) -> (i32, i32) {
    %c0_i32 = arith.constant 0 : i32
    %c0_i32_0 = arith.constant 0 : i32
    return %arg0, %c0_i32 : i32, i32
  }
}

</mosaic_0001>

<bundles_post_ra>
// kernel: neural_network_model_forward.1
= control target key start
LH: loop header
LB: loop body
LE: loop exit
PB: predicated region body
PF: predicated region fallthrough
CT: control target
= control target key end

     0   :  { %s1578_s15 = smov 0   ;;  %s2076_s0 = inlined_call_operand.vmem [shape: f32[256,8], index: 0, kind: input, shape index: {}]   ;;  %s2077_s1 = inlined_call_operand.vmem [shape: bf16[8,128], index: 1, kind: input, shape index: {}]   ;;  %s2078_s2 = inlined_call_operand.vmem [shape: bf16[384,128], index: 2, kind: input, shape index: {}]   ;;  %s2079_s3 = inlined_call_operand.vmem [shape: f32[8,128], index: 3, kind: input, shape index: {}]   ;;  %s2080_s4 = inlined_call_operand.vmem [shape: f32[256,4], index: 4, kind: output, shape index: {}]  }
   0x1 LB: > { %s1246_s16 = sadd.s32 4294967295, %s1551_s15   ;;  %p1250_p0 = scmp.ge.s32.totalorder %s1551_s15, 1  ;;  %s1551_s15 = sphi %s1578_s15, %s14_s15  }
   0x2   : > { %p163_p1 = scmp.lt.s32.totalorder %s1551_s15, 3 }
   0x4   : > { %p164_p2 = pnand %p1250_p0, %p163_p1 }
   0x5   : > { %s1251_s17 = sshll.u32 (!%p164_p2), %s1246_s16, 4  ;;  %v218_v0 = vlaneseq (!%p164_p2)  ;;  %vm237_vm0 = vcmask (!%p164_p2), 64512   ;;  %vm502_vm2 = vcmask (!%p164_p2), 1043456   ;;  %vm1173_vm3 = vcmask (!%p164_p2), 31744  }
   0x6   : > { %167 = sbr.rel (%p164_p2) target bundleno = 1245 (0x4dd), region = 36  ;;  %p190_p3 = scmp.lt.s32.totalorder (!%p164_p2), %s1251_s17, 31 }
   0x7   : > { %v1586_v1 = vand.u32 (!%p164_p2), 127, %v218_v0 }
   0x9   : > { %vm220_vm1 = vcmp.lt.s32.totalorder (!%p164_p2), %v1586_v1, 6  ;;  %v1497_v1 = vld [vmem:[%s2078_s2 + $0x40] sm:$0xff] (!%p164_p2)  }
   0xd   : > { %s2082_s17 = smov (!%p190_p3, %s1251_s17), 31 }
   0xe   : > { %s1252_s18 = sshll.u32 %s2082_s17, 3 }
   0xf   : > { %s1597_s21 = scalar_lea.vmem %s2076_s0, %s1252_s18  ;;  %s2039_s10 = scalar_lea.vmem %s2080_s4, %s1252_s18 }
  0x10   : > { %v1600_v2 = vld [vmem:[%s1597_s21] sm:$0xff]  ;;  %v1603_v3 = vld [vmem:[%s1597_s21 + $0x10] sm:$0xff]  ;;  %v1606_v4 = vld [vmem:[%s1597_s21 + $0x8] sm:$0xff] }
  0x11   : > { %v221_v5 = vsel %vm220_vm1, %v1600_v2, 0.0  ;;  %v223_v6 = vsel %vm220_vm1, %v1603_v3, 0.0  ;;  %v222_v7 = vsel %vm220_vm1, %v1606_v4, 0.0  ;;  %v1618_v8 = vld [vmem:[%s1597_s21 + $0x18] sm:$0xff]  ;;  %v1621_v9 = vld [vmem:[%s1597_s21 + $0x20] sm:$0xff]  ;;  %v1624_v10 = vld [vmem:[%s1597_s21 + $0x28] sm:$0xff] }
  0x12   : > { %v238_v11 = vsel %vm237_vm0, %v221_v5, 0.0  ;;  %v244_v12 = vsel %vm237_vm0, %v223_v6, 0.0  ;;  %v224_v13 = vsel %vm220_vm1, %v1618_v8, 0.0  ;;  %v1632_v14 = vld [vmem:[%s1597_s21 + $0x30] sm:$0xff]  ;;  %v1635_v15 = vld [vmem:[%s1597_s21 + $0x38] sm:$0xff]  ;;  %v1638_v16 = vld [vmem:[%s1597_s21 + $0x40] sm:$0xff] }
  0x13   : > { %239 = vadd.xlane.f32.xlu0 %v238_v11  ;;  %245 = vadd.xlane.f32.xlu1 %v244_v12  ;;  %v1641_v17 = vld [vmem:[%s1597_s21 + $0x48] sm:$0xff]  ;;  %v241_v18 = vsel %vm237_vm0, %v222_v7, 0.0  ;;  %v247_v19 = vsel %vm237_vm0, %v224_v13, 0.0  ;;  %v225_v20 = vsel %vm220_vm1, %v1621_v9, 0.0  ;;  %v226_v21 = vsel %vm220_vm1, %v1624_v10, 0.0  ;;  %v1661_v25 = vld [vmem:[%s1597_s21 + $0x50] sm:$0xff] }
  0x14   : > { %v227_v22 = vsel %vm220_vm1, %v1632_v14, 0.0  ;;  %v228_v23 = vsel %vm220_vm1, %v1635_v15, 0.0  ;;  %v229_v24 = vsel %vm220_vm1, %v1638_v16, 0.0  ;;  %v230_v26 = vsel %vm220_vm1, %v1641_v17, 0.0  ;;  %v1667_v27 = vld [vmem:[%s1597_s21 + $0x58] sm:$0xff]  ;;  %v1682_v36 = vld [vmem:[%s1597_s21 + $0x60] sm:$0xff] }
  0x15   : > { %v250_v28 = vsel %vm237_vm0, %v225_v20, 0.0  ;;  %v253_v29 = vsel %vm237_vm0, %v226_v21, 0.0  ;;  %v256_v30 = vsel %vm237_vm0, %v227_v22, 0.0  ;;  %v259_v31 = vsel %vm237_vm0, %v228_v23, 0.0  ;;  %v1685_v37 = vld [vmem:[%s1597_s21 + $0x68] sm:$0xff]  ;;  %v1696_v42 = vld [vmem:[%s1597_s21 + $0x70] sm:$0xff] }
  0x16   : > { %v262_v32 = vsel %vm237_vm0, %v229_v24, 0.0  ;;  %v231_v33 = vsel %vm220_vm1, %v1661_v25, 0.0  ;;  %v265_v34 = vsel %vm237_vm0, %v230_v26, 0.0  ;;  %v232_v35 = vsel %vm220_vm1, %v1667_v27, 0.0  ;;  %v1699_v43 = vld [vmem:[%s1597_s21 + $0x78] sm:$0xff] }
  0x17   : > { %242 = vadd.xlane.f32.xlu0 %v241_v18  ;;  %248 = vadd.xlane.f32.xlu1 %v247_v19  ;;  %v268_v38 = vsel %vm237_vm0, %v231_v33, 0.0  ;;  %v271_v39 = vsel %vm237_vm0, %v232_v35, 0.0  ;;  %v233_v40 = vsel %vm220_vm1, %v1682_v36, 0.0  ;;  %v234_v41 = vsel %vm220_vm1, %v1685_v37, 0.0 }
  0x18   : > { %v274_v44 = vsel %vm237_vm0, %v233_v40, 0.0  ;;  %v277_v45 = vsel %vm237_vm0, %v234_v41, 0.0  ;;  %v235_v46 = vsel %vm220_vm1, %v1696_v42, 0.0  ;;  %v236_v47 = vsel %vm220_vm1, %v1699_v43, 0.0 }
  0x19   : > { %v280_v48 = vsel %vm237_vm0, %v235_v46, 0.0  ;;  %v283_v49 = vsel %vm237_vm0, %v236_v47, 0.0 }
  0x1b   : > { %251 = vadd.xlane.f32.xlu0 %v250_v28  ;;  %254 = vadd.xlane.f32.xlu1 %v253_v29 }
  0x1f   : > { %257 = vadd.xlane.f32.xlu0 %v256_v30  ;;  %260 = vadd.xlane.f32.xlu1 %v259_v31 }
  0x23   : > { %263 = vadd.xlane.f32.xlu0 %v262_v32  ;;  %266 = vadd.xlane.f32.xlu1 %v265_v34 }
  0x27   : > { %269 = vadd.xlane.f32.xlu0 %v268_v38  ;;  %272 = vadd.xlane.f32.xlu1 %v271_v39 }
  0x2b   : > { %275 = vadd.xlane.f32.xlu0 %v274_v44  ;;  %278 = vadd.xlane.f32.xlu1 %v277_v45 }
  0x2f   : > { %281 = vadd.xlane.f32.xlu0 %v280_v48  ;;  %284 = vadd.xlane.f32.xlu1 %v283_v49 }
  0xa0   : > { %v240_v50 = vpop.xlane.xlu0 %239  ;;  %v246_v51 = vpop.xlane.xlu1 %245 }
  0xa1   : > { %v287_v52 = vmul.f32 0.16666667, %v240_v50  ;;  %v289_v53 = vmul.f32 0.16666667, %v246_v51 }
  0xa3   : > { %v1712_v54 = vsub.f32 %v1600_v2, %v287_v52  ;;  %v1715_v55 = vsub.f32 %v1603_v3, %v289_v53 }
  0xa4   : > { %v243_v56 = vpop.xlane.xlu0 %242  ;;  %v249_v57 = vpop.xlane.xlu1 %248 }
  0xa5   : > { %v288_v58 = vmul.f32 0.16666667, %v243_v56  ;;  %v290_v59 = vmul.f32 0.16666667, %v249_v57  ;;  %v319_v60 = vmul.f32 %v1712_v54, %v1712_v54  ;;  %v321_v61 = vmul.f32 %v1715_v55, %v1715_v55 }
  0xa7   : > { %v1722_v62 = vsub.f32 %v1606_v4, %v288_v58  ;;  %v1725_v63 = vsub.f32 %v1618_v8, %v290_v59  ;;  %v335_v0 = vsel %vm220_vm1, %v319_v60, 0.0  ;;  %v337_v5 = vsel %vm220_vm1, %v321_v61, 0.0 }
  0xa8   : > { %v252_v6 = vpop.xlane.xlu0 %251  ;;  %v351_v7 = vsel %vm237_vm0, %v335_v0, 0.0  ;;  %v255_v11 = vpop.xlane.xlu1 %254  ;;  %v357_v20 = vsel %vm237_vm0, %v337_v5, 0.0 }
  0xa9   : > { %v291_v12 = vmul.f32 0.16666667, %v252_v6  ;;  %352 = vadd.xlane.f32.xlu0 %v351_v7  ;;  %v292_v13 = vmul.f32 0.16666667, %v255_v11  ;;  %v320_v18 = vmul.f32 %v1722_v62, %v1722_v62  ;;  %v322_v19 = vmul.f32 %v1725_v63, %v1725_v63 }
  0xab   : > { %v1738_v21 = vsub.f32 %v1621_v9, %v291_v12  ;;  %v1741_v22 = vsub.f32 %v1624_v10, %v292_v13  ;;  %v336_v23 = vsel %vm220_vm1, %v320_v18, 0.0  ;;  %v338_v24 = vsel %vm220_vm1, %v322_v19, 0.0 }
  0xac   : > { %v258_v26 = vpop.xlane.xlu0 %257  ;;  %v354_v28 = vsel %vm237_vm0, %v336_v23, 0.0  ;;  %v261_v29 = vpop.xlane.xlu1 %260  ;;  %v360_v34 = vsel %vm237_vm0, %v338_v24, 0.0 }
  0xad   : > { %v293_v30 = vmul.f32 0.16666667, %v258_v26  ;;  %358 = vadd.xlane.f32.xlu0 %v357_v20  ;;  %355 = vadd.xlane.f32.xlu1 %v354_v28  ;;  %v294_v31 = vmul.f32 0.16666667, %v261_v29  ;;  %v323_v32 = vmul.f32 %v1738_v21, %v1738_v21  ;;  %v324_v33 = vmul.f32 %v1741_v22, %v1741_v22 }
  0xaf   : > { %v1754_v35 = vsub.f32 %v1632_v14, %v293_v30  ;;  %v1757_v38 = vsub.f32 %v1635_v15, %v294_v31  ;;  %v339_v39 = vsel %vm220_vm1, %v323_v32, 0.0  ;;  %v340_v40 = vsel %vm220_vm1, %v324_v33, 0.0 }
  0xb0   : > { %v264_v41 = vpop.xlane.xlu0 %263  ;;  %v363_v44 = vsel %vm237_vm0, %v339_v39, 0.0  ;;  %v267_v45 = vpop.xlane.xlu1 %266  ;;  %v366_v50 = vsel %vm237_vm0, %v340_v40, 0.0 }
  0xb1   : > { %v295_v46 = vmul.f32 0.16666667, %v264_v41  ;;  %361 = vadd.xlane.f32.xlu1 %v360_v34  ;;  %364 = vadd.xlane.f32.xlu0 %v363_v44  ;;  %v296_v47 = vmul.f32 0.16666667, %v267_v45  ;;  %v325_v48 = vmul.f32 %v1754_v35, %v1754_v35  ;;  %v326_v49 = vmul.f32 %v1757_v38, %v1757_v38 }
  0xb3   : > { %v1770_v51 = vsub.f32 %v1638_v16, %v295_v46  ;;  %v1773_v52 = vsub.f32 %v1641_v17, %v296_v47  ;;  %v341_v53 = vsel %vm220_vm1, %v325_v48, 0.0  ;;  %v342_v56 = vsel %vm220_vm1, %v326_v49, 0.0 }
  0xb4   : > { %v270_v57 = vpop.xlane.xlu0 %269  ;;  %v369_v58 = vsel %vm237_vm0, %v341_v53, 0.0  ;;  %v273_v59 = vpop.xlane.xlu1 %272  ;;  %v372_v6 = vsel %vm237_vm0, %v342_v56, 0.0 }
  0xb5   : > { %v297_v60 = vmul.f32 0.16666667, %v270_v57  ;;  %367 = vadd.xlane.f32.xlu1 %v366_v50  ;;  %370 = vadd.xlane.f32.xlu0 %v369_v58  ;;  %v298_v61 = vmul.f32 0.16666667, %v273_v59  ;;  %v327_v0 = vmul.f32 %v1770_v51, %v1770_v51  ;;  %v328_v5 = vmul.f32 %v1773_v52, %v1773_v52 }
  0xb7   : > { %v1786_v7 = vsub.f32 %v1661_v25, %v297_v60  ;;  %v1789_v11 = vsub.f32 %v1667_v27, %v298_v61  ;;  %v343_v12 = vsel %vm220_vm1, %v327_v0, 0.0  ;;  %v344_v13 = vsel %vm220_vm1, %v328_v5, 0.0 }
  0xb8   : > { %v276_v18 = vpop.xlane.xlu0 %275  ;;  %v375_v19 = vsel %vm237_vm0, %v343_v12, 0.0  ;;  %v279_v20 = vpop.xlane.xlu1 %278  ;;  %v378_v29 = vsel %vm237_vm0, %v344_v13, 0.0  ;;  %v1489_v13 = vld [vmem:[%s2078_s2] sm:$0xff]  }
  0xb9   : > { %v299_v23 = vmul.f32 0.16666667, %v276_v18  ;;  %373 = vadd.xlane.f32.xlu1 %v372_v6  ;;  %376 = vadd.xlane.f32.xlu0 %v375_v19  ;;  %v300_v24 = vmul.f32 0.16666667, %v279_v20  ;;  %v329_v26 = vmul.f32 %v1786_v7, %v1786_v7  ;;  %v330_v28 = vmul.f32 %v1789_v11, %v1789_v11  ;;  %v472_v6 = vld [vmem:[%s2077_s1] sm:$0xf] }
  0xba   : > { %1480 = vmatprep.subr.msk.bf16.mxu0 %vm502_vm2, %v472_v6  ;;  %v504_v12 = vsel %vm502_vm2, %v472_v6, 0  ;;  %v1490_v18 = vld [vmem:[%s2078_s2 + $0x8] sm:$0xff]   ;;  %1368 = vmatprep.subr.bf16.mxu1 %v1489_v13  ;;  %v1491_v19 = vld [vmem:[%s2078_s2 + $0x10] sm:$0xff]   ;;  %v1492_v20 = vld [vmem:[%s2078_s2 + $0x18] sm:$0xff]  }
  0xbb   : > { %v1802_v30 = vsub.f32 %v1682_v36, %v299_v23  ;;  %v1805_v31 = vsub.f32 %v1685_v37, %v300_v24  ;;  %v345_v32 = vsel %vm220_vm1, %v329_v26, 0.0  ;;  %v346_v33 = vsel %vm220_vm1, %v330_v28, 0.0  ;;  %1351 = vmatpush3.bf16.msra.mxu0 %v504_v12  ;;  %1369 = vmatpush3.bf16.msra.mxu1 %v1489_v13  ;;  %v1493_v23 = vld [vmem:[%s2078_s2 + $0x20] sm:$0xff]   ;;  %v1494_v24 = vld [vmem:[%s2078_s2 + $0x28] sm:$0xff]  }
  0xbc   : > { %v282_v34 = vpop.xlane.xlu0 %281  ;;  %v381_v39 = vsel %vm237_vm0, %v345_v32, 0.0  ;;  %v285_v40 = vpop.xlane.xlu1 %284  ;;  %v384_v47 = vsel %vm237_vm0, %v346_v33, 0.0  ;;  %1370 = vmatprep.subr.bf16.mxu1 %v1490_v18  ;;  %1400 = vmatprep.subr.bf16.mxu0 %v1497_v1 }
  0xbd   : > { %v301_v41 = vmul.f32 0.16666667, %v282_v34  ;;  %379 = vadd.xlane.f32.xlu1 %v378_v29  ;;  %382 = vadd.xlane.f32.xlu0 %v381_v39  ;;  %v302_v44 = vmul.f32 0.16666667, %v285_v40  ;;  %v331_v45 = vmul.f32 %v1802_v30, %v1802_v30  ;;  %v332_v46 = vmul.f32 %v1805_v31, %v1805_v31 }
  0xbf   : > { %v1818_v48 = vsub.f32 %v1696_v42, %v301_v41  ;;  %v1821_v49 = vsub.f32 %v1699_v43, %v302_v44  ;;  %v347_v50 = vsel %vm220_vm1, %v331_v45, 0.0  ;;  %v348_v53 = vsel %vm220_vm1, %v332_v46, 0.0  ;;  %1371 = vmatpush3.bf16.msra.mxu1 %v1490_v18 }
  0xc0   : > { %v387_v56 = vsel %vm237_vm0, %v347_v50, 0.0  ;;  %v390_v59 = vsel %vm237_vm0, %v348_v53, 0.0  ;;  %1372 = vmatprep.subr.bf16.mxu1 %v1491_v19 }
  0xc1   : > { %385 = vadd.xlane.f32.xlu1 %v384_v47  ;;  %388 = vadd.xlane.f32.xlu0 %v387_v56  ;;  %v333_v57 = vmul.f32 %v1818_v48, %v1818_v48  ;;  %v334_v58 = vmul.f32 %v1821_v49, %v1821_v49 }
  0xc3   : > { %v349_v60 = vsel %vm220_vm1, %v333_v57, 0.0  ;;  %v350_v61 = vsel %vm220_vm1, %v334_v58, 0.0  ;;  %1373 = vmatpush3.bf16.msra.mxu1 %v1491_v19 }
  0xc4   : > { %v393_v0 = vsel %vm237_vm0, %v349_v60, 0.0  ;;  %v396_v5 = vsel %vm237_vm0, %v350_v61, 0.0  ;;  %1374 = vmatprep.subr.bf16.mxu1 %v1492_v20 }
  0xc5   : > { %391 = vadd.xlane.f32.xlu1 %v390_v59  ;;  %394 = vadd.xlane.f32.xlu0 %v393_v0 }
  0xc7   : > { %1375 = vmatpush3.bf16.msra.mxu1 %v1492_v20 }
  0xc8   : > { %1376 = vmatprep.subr.bf16.mxu1 %v1493_v23 }
  0xc9   : > { %397 = vadd.xlane.f32.xlu1 %v396_v5 }
  0xcb   : > { %1377 = vmatpush3.bf16.msra.mxu1 %v1493_v23 }
  0xcc   : > { %1378 = vmatprep.subr.bf16.mxu1 %v1494_v24 }
  0xcf   : > { %1379 = vmatpush3.bf16.msra.mxu1 %v1494_v24 }
 0x136   : > { %v353_v26 = vpop.xlane.xlu0 %352 }
 0x137   : > { %v400_v28 = vmul.f32 0.2, %v353_v26 }
 0x139   : > { %1513 = vrsqrt.f32 %v400_v28 }
 0x13a   : > { %v356_v29 = vpop.xlane.xlu1 %355  ;;  %v359_v32 = vpop.xlane.xlu0 %358 }
 0x13b   : > { %v401_v33 = vmul.f32 0.2, %v356_v29  ;;  %v402_v34 = vmul.f32 0.2, %v359_v32 }
 0x13d   : > { %1515 = vrsqrt.f32 %v401_v33 }
 0x13e   : > { %1517 = vrsqrt.f32 %v402_v34  ;;  %v362_v39 = vpop.xlane.xlu1 %361  ;;  %v365_v40 = vpop.xlane.xlu0 %364 }
 0x13f   : > { %v403_v41 = vmul.f32 0.2, %v362_v39  ;;  %v404_v44 = vmul.f32 0.2, %v365_v40 }
 0x141   : > { %1519 = vrsqrt.f32 %v403_v41 }
 0x142   : > { %1521 = vrsqrt.f32 %v404_v44  ;;  %v368_v45 = vpop.xlane.xlu1 %367  ;;  %v371_v46 = vpop.xlane.xlu0 %370 }
 0x143   : > { %v1514_v47 = vpop.eup %1513  ;;  %v405_v50 = vmul.f32 0.2, %v368_v45  ;;  %v406_v53 = vmul.f32 0.2, %v371_v46 }
 0x144   : > { %v432_v58 = vmul.f32 %v1514_v47, %v1712_v54 }
 0x145   : > { %1523 = vrsqrt.f32 %v405_v50 }
 0x146   : > { %1525 = vrsqrt.f32 %v406_v53  ;;  %v374_v56 = vpop.xlane.xlu1 %373  ;;  %v377_v57 = vpop.xlane.xlu0 %376  ;;  %v448_v18 = vsel %vm220_vm1, %v432_v58, %v1600_v2 }
 0x147   : > { %v1516_v59 = vpop.eup %1515  ;;  %v407_v60 = vmul.f32 0.2, %v374_v56  ;;  %v408_v61 = vmul.f32 0.2, %v377_v57 }
 0x148   : > { %v1518_v0 = vpop.eup %1517  ;;  %v433_v5 = vmul.f32 %v1516_v59, %v1722_v62 }
 0x149   : > { %1527 = vrsqrt.f32 %v407_v60  ;;  %v434_v6 = vmul.f32 %v1518_v0, %v1715_v55 }
 0x14a   : > { %1529 = vrsqrt.f32 %v408_v61  ;;  %v380_v12 = vpop.xlane.xlu1 %379  ;;  %v383_v13 = vpop.xlane.xlu0 %382  ;;  %v449_v54 = vsel %vm220_vm1, %v433_v5, %v1606_v4 }
 0x14b   : > { %v1520_v19 = vpop.eup %1519  ;;  %v409_v20 = vmul.f32 0.2, %v380_v12  ;;  %v410_v23 = vmul.f32 0.2, %v383_v13  ;;  %v464_v24 = vpack.c.bf16 %v449_v54, %v448_v18  ;;  %v450_v2 = vsel %vm220_vm1, %v434_v6, %v1603_v3 }
 0x14c   : > { %v1522_v26 = vpop.eup %1521  ;;  %v435_v62 = vmul.f32 %v1520_v19, %v1725_v63 }
 0x14d   : > { %1531 = vrsqrt.f32 %v409_v20  ;;  %1352 = vmatprep.mubr.msk.bf16.mxu0 %vm237_vm0, %v464_v24  ;;  %v436_v55 = vmul.f32 %v1522_v26, %v1738_v21  ;;  %v1502_v24 = vld [vmem:[%s2078_s2 + $0x68] sm:$0xff]   ;;  %v1255_v26 = vld [vmem:[%s2079_s3] ss:$0 sm:$0xff] }
 0x14e   : > { %1533 = vrsqrt.f32 %v410_v23  ;;  %v386_v28 = vpop.xlane.xlu1 %385  ;;  %v389_v29 = vpop.xlane.xlu0 %388  ;;  %v451_v4 = vsel %vm220_vm1, %v435_v62, %v1618_v8  ;;  %v1501_v23 = vld [vmem:[%s2078_s2 + $0x60] sm:$0xff]  }
 0x14f   : > { %v1524_v32 = vpop.eup %1523  ;;  %v411_v33 = vmul.f32 0.2, %v386_v28  ;;  %v412_v34 = vmul.f32 0.2, %v389_v29  ;;  %v465_v63 = vpack.c.bf16 %v451_v4, %v450_v2  ;;  %v452_v3 = vsel %vm220_vm1, %v436_v55, %v1621_v9 }
 0x150   : > { %v1526_v39 = vpop.eup %1525  ;;  %v437_v40 = vmul.f32 %v1524_v32, %v1741_v22 }
 0x151   : > { %1535 = vrsqrt.f32 %v411_v33  ;;  %1353 = vmatmul.mubr.msk.bf16.vlgmr.msra.gmra.mrb[0].mxu0 %vm237_vm0, %v465_v63  ;;  %v438_v21 = vmul.f32 %v1526_v39, %v1754_v35 }
 0x152   : > { %1537 = vrsqrt.f32 %v412_v34  ;;  %v392_v41 = vpop.xlane.xlu1 %391  ;;  %v395_v44 = vpop.xlane.xlu0 %394  ;;  %v453_v8 = vsel %vm220_vm1, %v437_v40, %v1624_v10  ;;  %1401 = vmatpush3.bf16.msra.mxu0 %v1497_v1  ;;  %v1504_v1 = vld [vmem:[%s2078_s2 + $0x78] sm:$0xff]  }
 0x153   : > { %v1528_v45 = vpop.eup %1527  ;;  %v413_v46 = vmul.f32 0.2, %v392_v41  ;;  %v414_v47 = vmul.f32 0.2, %v395_v44  ;;  %v466_v22 = vpack.c.bf16 %v453_v8, %v452_v3  ;;  %v454_v9 = vsel %vm220_vm1, %v438_v21, %v1632_v14 }
 0x154   : > { %v1530_v50 = vpop.eup %1529  ;;  %v439_v53 = vmul.f32 %v1528_v45, %v1757_v38 }
 0x155   : > { %1539 = vrsqrt.f32 %v413_v46  ;;  %1356 = vmatprep.mubr.msk.bf16.mxu0 %vm237_vm0, %v466_v22  ;;  %v440_v35 = vmul.f32 %v1530_v50, %v1770_v51 }
 0x156   : > { %1541 = vrsqrt.f32 %v414_v47  ;;  %v398_v56 = vpop.xlane.xlu1 %397  ;;  %v455_v10 = vsel %vm220_vm1, %v439_v53, %v1635_v15 }
 0x157   : > { %v1532_v57 = vpop.eup %1531  ;;  %v415_v58 = vmul.f32 0.2, %v398_v56  ;;  %v467_v59 = vpack.c.bf16 %v455_v10, %v454_v9  ;;  %v456_v61 = vsel %vm220_vm1, %v440_v35, %v1638_v16 }
 0x158   : > { %v1534_v60 = vpop.eup %1533  ;;  %v441_v38 = vmul.f32 %v1532_v57, %v1773_v52 }
 0x159   : > { %1543 = vrsqrt.f32 %v415_v58  ;;  %1357 = vmatmul.mubr.msk.bf16.gmra.mrb[4].mxu0 %vm237_vm0, %v467_v59  ;;  %v442_v51 = vmul.f32 %v1534_v60, %v1786_v7 }
 0x15a   : > { %v457_v14 = vsel %vm220_vm1, %v441_v38, %v1641_v17 }
 0x15b   : > { %v1536_v15 = vpop.eup %1535  ;;  %v468_v0 = vpack.c.bf16 %v457_v14, %v456_v61  ;;  %v458_v7 = vsel %vm220_vm1, %v442_v51, %v1661_v25 }
 0x15c   : > { %v1538_v5 = vpop.eup %1537  ;;  %v443_v6 = vmul.f32 %v1536_v15, %v1789_v11 }
 0x15d   : > { %1360 = vmatprep.mubr.msk.bf16.mxu0 %vm237_vm0, %v468_v0  ;;  %v444_v52 = vmul.f32 %v1538_v5, %v1802_v30 }
 0x15e   : > { %v459_v16 = vsel %vm220_vm1, %v443_v6, %v1667_v27 }
 0x15f   : > { %v1540_v12 = vpop.eup %1539  ;;  %v469_v13 = vpack.c.bf16 %v459_v16, %v458_v7  ;;  %v460_v30 = vsel %vm220_vm1, %v444_v52, %v1682_v36  ;;  %v1495_v36 = vld [vmem:[%s2078_s2 + $0x30] sm:$0xff]  }
 0x160   : > { %v1542_v17 = vpop.eup %1541  ;;  %v445_v18 = vmul.f32 %v1540_v12, %v1805_v31  ;;  %1380 = vmatprep.subr.bf16.mxu1 %v1495_v36 }
 0x161   : > { %1361 = vmatmul.mubr.msk.bf16.gmra.mrb[8].mxu0 %vm237_vm0, %v469_v13  ;;  %v446_v11 = vmul.f32 %v1542_v17, %v1818_v48  ;;  %1381 = vmatpush3.bf16.msra.mxu1 %v1495_v36 }
 0x162   : > { %v461_v25 = vsel %vm220_vm1, %v445_v18, %v1685_v37  ;;  %v1496_v37 = vld [vmem:[%s2078_s2 + $0x38] sm:$0xff]  }
 0x163   : > { %v1544_v54 = vpop.eup %1543  ;;  %v470_v19 = vpack.c.bf16 %v461_v25, %v460_v30  ;;  %v462_v31 = vsel %vm220_vm1, %v446_v11, %v1696_v42  ;;  %1382 = vmatprep.subr.bf16.mxu1 %v1496_v37  ;;  %v1498_v42 = vld [vmem:[%s2078_s2 + $0x48] sm:$0xff]  }
 0x164   : > { %v447_v27 = vmul.f32 %v1544_v54, %v1821_v49  ;;  %1402 = vmatprep.subr.bf16.mxu0 %v1498_v42  ;;  %v1500_v49 = vld [vmem:[%s2078_s2 + $0x58] sm:$0xff]  }
 0x165   : > { %1364 = vmatprep.mubr.msk.bf16.mxu0 %vm237_vm0, %v470_v19  ;;  %1383 = vmatpush3.bf16.msra.mxu1 %v1496_v37  ;;  %v1503_v37 = vld [vmem:[%s2078_s2 + $0x70] sm:$0xff]  }
 0x166   : > { %v463_v48 = vsel %vm220_vm1, %v447_v27, %v1699_v43  ;;  %v1499_v43 = vld [vmem:[%s2078_s2 + $0x50] sm:$0xff]   ;;  %1403 = vmatpush3.bf16.msra.mxu0 %v1498_v42  ;;  %v1505_v42 = vld [vmem:[%s2078_s2 + $0x80] sm:$0xff]  }
 0x167   : > { %v471_v20 = vpack.c.bf16 %v463_v48, %v462_v31  ;;  %1404 = vmatprep.subr.bf16.mxu0 %v1499_v43  ;;  %1464 = vmatprep.subr.bf16.mxu1 %v1505_v42 }
 0x169   : > { %1365 = vmatmul.mubr.msk.bf16.gmra.mrb[12].mxu0 %vm237_vm0, %v471_v20 }
 0x16a   : > { %1405 = vmatpush3.bf16.msra.mxu0 %v1499_v43  ;;  %v1506_v43 = vld [vmem:[%s2078_s2 + $0x88] sm:$0xff]  }
 0x16b   : > { %1406 = vmatprep.subr.bf16.mxu0 %v1500_v49 }
 0x16e   : > { %1407 = vmatpush3.bf16.msra.mxu0 %v1500_v49  ;;  %v1507_v49 = vld [vmem:[%s2078_s2 + $0x90] sm:$0xff]  }
 0x16f   : > { %1408 = vmatprep.subr.bf16.mxu0 %v1501_v23 }
 0x172   : > { %1409 = vmatpush3.bf16.msra.mxu0 %v1501_v23  ;;  %v1977_v23 = vld [vmem:[%s2078_s2 + $0x98] sm:$0xff]  }
 0x173   : > { %1410 = vmatprep.subr.bf16.mxu0 %v1502_v24 }
 0x176   : > { %1411 = vmatpush3.bf16.msra.mxu0 %v1502_v24  ;;  %v1983_v24 = vld [vmem:[%s2078_s2 + $0xa0] sm:$0xff]  }
 0x177   : > { %1412 = vmatprep.subr.bf16.mxu0 %v1503_v37 }
 0x17a   : > { %1413 = vmatpush3.bf16.msra.mxu0 %v1503_v37 }
 0x17b   : > { %1414 = vmatprep.subr.bf16.mxu0 %v1504_v1 }
 0x17e   : > { %1415 = vmatpush3.bf16.msra.mxu0 %v1504_v1  ;;  %v1511_v1 = vld [vmem:[%s2078_s2 + $0xb0] sm:$0xff]  }
 0x17f   : > { %1432 = vmatprep.subr.bf16.mxu0 %v1505_v42 }
 0x224   : > { %v1354_v62 = vpop.f32.mrb[0].mxu0 }
 0x225   : > { %v549_v55 = vadd.f32 %v1354_v62, %v1255_v26  ;;  %v540_v28 = vpop.f32.mrb[1].mxu0  ;;  %v1998_v62 = vld [vmem:[%s2079_s3 + $0x1] ss:$0 sm:$0xff] }
 0x226   : > { %v541_v29 = vadd.f32 %v1255_v26, %v540_v28  ;;  %v1355_v2 = vpop.f32.mrb[2].mxu0 }
 0x227   : > { %v552_v4 = vadd.f32 %v1355_v2, %v1255_v26  ;;  %v543_v32 = vpop.f32.mrb[3].mxu0  ;;  %v605_v34 = vmax.f32 %v549_v55, 0.0 }
 0x228   : > { %v544_v33 = vadd.f32 %v1255_v26, %v543_v32  ;;  %v603_v39 = vmax.f32 %v541_v29, 0.0 }
 0x229   : > { %v606_v63 = vmax.f32 %v552_v4, 0.0 }
 0x22a   : > { %v604_v40 = vmax.f32 %v544_v33, 0.0 }
 0x22b   : > { %v636_v21 = vpack.c.bf16 %v606_v63, %v605_v34 }
 0x22c   : > { %v1358_v41 = vpop.f32.mrb[4].mxu0  ;;  %v635_v44 = vpack.c.bf16 %v604_v40, %v603_v39 }
 0x22d   : > { %v565_v3 = vadd.f32 %v1358_v41, %v1255_v26  ;;  %v556_v8 = vpop.f32.mrb[5].mxu0 }
 0x22e   : > { %v557_v45 = vadd.f32 %v1255_v26, %v556_v8  ;;  %v1359_v46 = vpop.f32.mrb[6].mxu0  ;;  %1384 = vmatprep.mubr.bf16.mxu1 %v635_v44 }
 0x22f   : > { %v568_v47 = vadd.f32 %v1359_v46, %v1255_v26  ;;  %v559_v22 = vpop.f32.mrb[7].mxu0  ;;  %1385 = vmatmul.mubr.bf16.vlgmr.msra.gmra.mrb[0].mxu1 %v636_v21  ;;  %v609_v53 = vmax.f32 %v565_v3, 0.0 }
 0x230   : > { %v560_v50 = vadd.f32 %v1255_v26, %v559_v22  ;;  %v607_v56 = vmax.f32 %v557_v45, 0.0  ;;  %1472 = vmatpush3.bf16.msra.mxu1 %v1505_v42 }
 0x231   : > { %v610_v35 = vmax.f32 %v568_v47, 0.0  ;;  %1465 = vmatprep.subr.bf16.mxu1 %v1506_v43 }
 0x232   : > { %v608_v9 = vmax.f32 %v560_v50, 0.0 }
 0x233   : > { %v638_v10 = vpack.c.bf16 %v610_v35, %v609_v53 }
 0x234   : > { %v637_v57 = vpack.c.bf16 %v608_v9, %v607_v56  ;;  %v1362_v58 = vpop.f32.mrb[8].mxu0  ;;  %1473 = vmatpush3.bf16.msra.mxu1 %v1506_v43 }
 0x235   : > { %v581_v59 = vadd.f32 %v1362_v58, %v1255_v26  ;;  %v572_v60 = vpop.f32.mrb[9].mxu0  ;;  %1466 = vmatprep.subr.bf16.mxu1 %v1507_v49 }
 0x236   : > { %v573_v38 = vadd.f32 %v1255_v26, %v572_v60  ;;  %v1363_v51 = vpop.f32.mrb[10].mxu0  ;;  %1388 = vmatprep.mubr.bf16.mxu1 %v637_v57 }
 0x237   : > { %v584_v61 = vadd.f32 %v1363_v51, %v1255_v26  ;;  %v575_v14 = vpop.f32.mrb[11].mxu0  ;;  %1389 = vmatmul.mubr.bf16.gmra.mrb[4].mxu1 %v638_v10  ;;  %v613_v0 = vmax.f32 %v581_v59, 0.0 }
 0x238   : > { %v576_v15 = vadd.f32 %v1255_v26, %v575_v14  ;;  %v611_v6 = vmax.f32 %v573_v38, 0.0  ;;  %1474 = vmatpush3.bf16.msra.mxu1 %v1507_v49 }
 0x239   : > { %v614_v5 = vmax.f32 %v584_v61, 0.0  ;;  %1467 = vmatprep.subr.bf16.mxu1 %v1977_v23 }
 0x23a   : > { %v612_v52 = vmax.f32 %v576_v15, 0.0 }
 0x23b   : > { %v640_v7 = vpack.c.bf16 %v614_v5, %v613_v0 }
 0x23c   : > { %v639_v16 = vpack.c.bf16 %v612_v52, %v611_v6  ;;  %v1366_v12 = vpop.f32.mrb[12].mxu0  ;;  %1475 = vmatpush3.bf16.msra.mxu1 %v1977_v23 }
 0x23d   : > { %v597_v13 = vadd.f32 %v1366_v12, %v1255_v26  ;;  %v588_v17 = vpop.f32.mrb[13].mxu0  ;;  %1468 = vmatprep.subr.bf16.mxu1 %v1983_v24 }
 0x23e   : > { %v589_v18 = vadd.f32 %v1255_v26, %v588_v17  ;;  %v1367_v11 = vpop.f32.mrb[14].mxu0  ;;  %1392 = vmatprep.mubr.bf16.mxu1 %v639_v16 }
 0x23f   : > { %v600_v30 = vadd.f32 %v1367_v11, %v1255_v26  ;;  %v591_v25 = vpop.f32.mrb[15].mxu0  ;;  %1393 = vmatmul.mubr.bf16.gmra.mrb[8].mxu1 %v640_v7  ;;  %v617_v19 = vmax.f32 %v597_v13, 0.0 }
 0x240   : > { %v592_v54 = vadd.f32 %v1255_v26, %v591_v25  ;;  %v615_v31 = vmax.f32 %v589_v18, 0.0  ;;  %v1990_v26 = vld [vmem:[%s2078_s2 + $0xa8] sm:$0xff]   ;;  %1476 = vmatpush3.bf16.msra.mxu1 %v1983_v24 }
 0x241   : > { %v618_v27 = vmax.f32 %v600_v30, 0.0  ;;  %1469 = vmatprep.subr.bf16.mxu1 %v1990_v26 }
 0x242   : > { %v616_v48 = vmax.f32 %v592_v54, 0.0 }
 0x243   : > { %v642_v20 = vpack.c.bf16 %v618_v27, %v617_v19 }
 0x244   : > { %v641_v36 = vpack.c.bf16 %v616_v48, %v615_v31  ;;  %1477 = vmatpush3.bf16.msra.mxu1 %v1990_v26 }
 0x245   : > { %1470 = vmatprep.subr.bf16.mxu1 %v1511_v1 }
 0x246   : > { %1396 = vmatprep.mubr.bf16.mxu1 %v641_v36 }
 0x247   : > { %1397 = vmatmul.mubr.bf16.gmra.mrb[12].mxu1 %v642_v20 }
 0x248   : > { %1478 = vmatpush3.bf16.msra.mxu1 %v1511_v1 }
 0x302   : > { %v1386_v55 = vpop.f32.mrb[0].mxu1 }
 0x303   : > { %v739_v28 = vadd.f32 %v1386_v55, %v1998_v62  ;;  %v730_v29 = vpop.f32.mrb[1].mxu1 }
 0x304   : > { %v731_v2 = vadd.f32 %v1998_v62, %v730_v29  ;;  %v1387_v4 = vpop.f32.mrb[2].mxu1 }
 0x305   : > { %v742_v32 = vadd.f32 %v1387_v4, %v1998_v62  ;;  %v733_v33 = vpop.f32.mrb[3].mxu1  ;;  %v795_v63 = vmax.f32 %v739_v28, 0.0 }
 0x306   : > { %v734_v34 = vadd.f32 %v1998_v62, %v733_v33  ;;  %v793_v40 = vmax.f32 %v731_v2, 0.0 }
 0x307   : > { %v796_v39 = vmax.f32 %v742_v32, 0.0 }
 0x308   : > { %v794_v21 = vmax.f32 %v734_v34, 0.0 }
 0x309   : > { %v826_v41 = vpack.c.bf16 %v796_v39, %v795_v63 }
 0x30a   : > { %v825_v44 = vpack.c.bf16 %v794_v21, %v793_v40  ;;  %v1390_v3 = vpop.f32.mrb[4].mxu1 }
 0x30b   : > { %v755_v8 = vadd.f32 %v1390_v3, %v1998_v62  ;;  %v746_v45 = vpop.f32.mrb[5].mxu1 }
 0x30c   : > { %v747_v46 = vadd.f32 %v1998_v62, %v746_v45  ;;  %v1391_v47 = vpop.f32.mrb[6].mxu1  ;;  %1416 = vmatprep.mubr.bf16.mxu0 %v825_v44 }
 0x30d   : > { %v758_v22 = vadd.f32 %v1391_v47, %v1998_v62  ;;  %v749_v50 = vpop.f32.mrb[7].mxu1  ;;  %1417 = vmatmul.mubr.bf16.vlgmr.msra.gmra.mrb[16].mxu0 %v826_v41  ;;  %v799_v35 = vmax.f32 %v755_v8, 0.0 }
 0x30e   : > { %v750_v53 = vadd.f32 %v1998_v62, %v749_v50  ;;  %1433 = vmatpush3.bf16.msra.mxu0 %v1505_v42  ;;  %v797_v9 = vmax.f32 %v747_v46, 0.0  ;;  %v1512_v42 = vld [vmem:[%s2078_s2 + $0xb8] sm:$0xff]  }
 0x30f   : > { %v800_v56 = vmax.f32 %v758_v22, 0.0  ;;  %1434 = vmatprep.subr.bf16.mxu0 %v1506_v43  ;;  %1471 = vmatprep.subr.bf16.mxu1 %v1512_v42 }
 0x310   : > { %v798_v10 = vmax.f32 %v750_v53, 0.0  ;;  %1479 = vmatpush3.bf16.msra.mxu1 %v1512_v42 }
 0x311   : > { %v828_v57 = vpack.c.bf16 %v800_v56, %v799_v35 }
 0x312   : > { %v827_v58 = vpack.c.bf16 %v798_v10, %v797_v9  ;;  %v1394_v59 = vpop.f32.mrb[8].mxu1  ;;  %1435 = vmatpush3.bf16.msra.mxu0 %v1506_v43  ;;  %v1273_v43 = vld [vmem:[%s2079_s3 + $0x2] ss:$0 sm:$0xff] }
 0x313   : > { %v771_v60 = vadd.f32 %v1394_v59, %v1998_v62  ;;  %v762_v38 = vpop.f32.mrb[9].mxu1  ;;  %1436 = vmatprep.subr.bf16.mxu0 %v1507_v49 }
 0x314   : > { %v763_v51 = vadd.f32 %v1998_v62, %v762_v38  ;;  %v1395_v61 = vpop.f32.mrb[10].mxu1  ;;  %1420 = vmatprep.mubr.bf16.mxu0 %v827_v58 }
 0x315   : > { %v774_v14 = vadd.f32 %v1395_v61, %v1998_v62  ;;  %v765_v15 = vpop.f32.mrb[11].mxu1  ;;  %1421 = vmatmul.mubr.bf16.gmra.mrb[20].mxu0 %v828_v57  ;;  %v803_v5 = vmax.f32 %v771_v60, 0.0 }
 0x316   : > { %v766_v0 = vadd.f32 %v1998_v62, %v765_v15  ;;  %1437 = vmatpush3.bf16.msra.mxu0 %v1507_v49  ;;  %v801_v52 = vmax.f32 %v763_v51, 0.0 }
 0x317   : > { %v804_v6 = vmax.f32 %v774_v14, 0.0  ;;  %1438 = vmatprep.subr.bf16.mxu0 %v1977_v23 }
 0x318   : > { %v802_v7 = vmax.f32 %v766_v0, 0.0 }
 0x319   : > { %v830_v16 = vpack.c.bf16 %v804_v6, %v803_v5 }
 0x31a   : > { %v829_v12 = vpack.c.bf16 %v802_v7, %v801_v52  ;;  %v1398_v13 = vpop.f32.mrb[12].mxu1  ;;  %1439 = vmatpush3.bf16.msra.mxu0 %v1977_v23 }
 0x31b   : > { %v787_v17 = vadd.f32 %v1398_v13, %v1998_v62  ;;  %v778_v18 = vpop.f32.mrb[13].mxu1  ;;  %1440 = vmatprep.subr.bf16.mxu0 %v1983_v24 }
 0x31c   : > { %v779_v11 = vadd.f32 %v1998_v62, %v778_v18  ;;  %v1399_v30 = vpop.f32.mrb[14].mxu1  ;;  %1424 = vmatprep.mubr.bf16.mxu0 %v829_v12 }
 0x31d   : > { %v790_v25 = vadd.f32 %v1399_v30, %v1998_v62  ;;  %v781_v54 = vpop.f32.mrb[15].mxu1  ;;  %1425 = vmatmul.mubr.bf16.gmra.mrb[24].mxu0 %v830_v16  ;;  %v807_v27 = vmax.f32 %v787_v17, 0.0 }
 0x31e   : > { %v782_v19 = vadd.f32 %v1998_v62, %v781_v54  ;;  %1441 = vmatpush3.bf16.msra.mxu0 %v1983_v24  ;;  %v805_v48 = vmax.f32 %v779_v11, 0.0 }
 0x31f   : > { %v808_v31 = vmax.f32 %v790_v25, 0.0  ;;  %1442 = vmatprep.subr.bf16.mxu0 %v1990_v26 }
 0x320   : > { %v806_v20 = vmax.f32 %v782_v19, 0.0 }
 0x321   : > { %v832_v36 = vpack.c.bf16 %v808_v31, %v807_v27  ;;  %v1282_v31 = vld [vmem:[%s2079_s3 + $0x3] ss:$0 sm:$0xff] }
 0x322   : > { %v831_v37 = vpack.c.bf16 %v806_v20, %v805_v48  ;;  %1443 = vmatpush3.bf16.msra.mxu0 %v1990_v26 }
 0x323   : > { %1444 = vmatprep.subr.bf16.mxu0 %v1511_v1 }
 0x324   : > { %1428 = vmatprep.mubr.bf16.mxu0 %v831_v37 }
 0x325   : > { %1429 = vmatmul.mubr.bf16.gmra.mrb[28].mxu0 %v832_v36 }
 0x326   : > { %1445 = vmatpush3.bf16.msra.mxu0 %v1511_v1 }
 0x327   : > { %1446 = vmatprep.subr.bf16.mxu0 %v1512_v42 }
 0x32a   : > { %1447 = vmatpush3.bf16.msra.mxu0 %v1512_v42 }
 0x3e0   : > { %v1418_v49 = vpop.f32.mrb[16].mxu0 }
 0x3e1   : > { %v929_v23 = vadd.f32 %v1418_v49, %v1273_v43  ;;  %v920_v24 = vpop.f32.mrb[17].mxu0 }
 0x3e2   : > { %v921_v26 = vadd.f32 %v1273_v43, %v920_v24  ;;  %v1419_v62 = vpop.f32.mrb[18].mxu0 }
 0x3e3   : > { %v932_v55 = vadd.f32 %v1419_v62, %v1273_v43  ;;  %v923_v28 = vpop.f32.mrb[19].mxu0  ;;  %v985_v2 = vmax.f32 %v929_v23, 0.0 }
 0x3e4   : > { %v924_v29 = vadd.f32 %v1273_v43, %v923_v28  ;;  %v983_v32 = vmax.f32 %v921_v26, 0.0 }
 0x3e5   : > { %v986_v4 = vmax.f32 %v932_v55, 0.0 }
 0x3e6   : > { %v984_v33 = vmax.f32 %v924_v29, 0.0 }
 0x3e7   : > { %v1016_v34 = vpack.c.bf16 %v986_v4, %v985_v2 }
 0x3e8   : > { %v1015_v63 = vpack.c.bf16 %v984_v33, %v983_v32  ;;  %v1422_v39 = vpop.f32.mrb[20].mxu0 }
 0x3e9   : > { %v945_v40 = vadd.f32 %v1422_v39, %v1273_v43  ;;  %v936_v21 = vpop.f32.mrb[21].mxu0 }
 0x3ea   : > { %v937_v41 = vadd.f32 %v1273_v43, %v936_v21  ;;  %v1423_v44 = vpop.f32.mrb[22].mxu0  ;;  %1448 = vmatprep.mubr.bf16.mxu0 %v1015_v63 }
 0x3eb   : > { %v948_v3 = vadd.f32 %v1423_v44, %v1273_v43  ;;  %v939_v8 = vpop.f32.mrb[23].mxu0  ;;  %1449 = vmatmul.mubr.bf16.vlgmr.msra.gmra.mrb[32].mxu0 %v1016_v34  ;;  %v989_v46 = vmax.f32 %v945_v40, 0.0 }
 0x3ec   : > { %v940_v45 = vadd.f32 %v1273_v43, %v939_v8  ;;  %v987_v22 = vmax.f32 %v937_v41, 0.0 }
 0x3ed   : > { %v990_v47 = vmax.f32 %v948_v3, 0.0 }
 0x3ee   : > { %v988_v50 = vmax.f32 %v940_v45, 0.0 }
 0x3ef   : > { %v1018_v53 = vpack.c.bf16 %v990_v47, %v989_v46 }
 0x3f0   : > { %v1017_v35 = vpack.c.bf16 %v988_v50, %v987_v22  ;;  %v1426_v56 = vpop.f32.mrb[24].mxu0 }
 0x3f1   : > { %v961_v9 = vadd.f32 %v1426_v56, %v1273_v43  ;;  %v952_v10 = vpop.f32.mrb[25].mxu0 }
 0x3f2   : > { %v953_v57 = vadd.f32 %v1273_v43, %v952_v10  ;;  %v1427_v58 = vpop.f32.mrb[26].mxu0  ;;  %1452 = vmatprep.mubr.bf16.mxu1 %v1017_v35 }
 0x3f3   : > { %v964_v59 = vadd.f32 %v1427_v58, %v1273_v43  ;;  %v955_v60 = vpop.f32.mrb[27].mxu0  ;;  %1453 = vmatmul.mubr.bf16.vlgmr.msra.gmra.mrb[16].mxu1 %v1018_v53  ;;  %v993_v51 = vmax.f32 %v961_v9, 0.0 }
 0x3f4   : > { %v956_v38 = vadd.f32 %v1273_v43, %v955_v60  ;;  %v991_v14 = vmax.f32 %v953_v57, 0.0 }
 0x3f5   : > { %v994_v61 = vmax.f32 %v964_v59, 0.0 }
 0x3f6   : > { %v992_v15 = vmax.f32 %v956_v38, 0.0 }
 0x3f7   : > { %v1020_v0 = vpack.c.bf16 %v994_v61, %v993_v51 }
 0x3f8   : > { %v1019_v5 = vpack.c.bf16 %v992_v15, %v991_v14  ;;  %v1430_v6 = vpop.f32.mrb[28].mxu0 }
 0x3f9   : > { %v977_v52 = vadd.f32 %v1430_v6, %v1273_v43  ;;  %v968_v7 = vpop.f32.mrb[29].mxu0 }
 0x3fa   : > { %v969_v16 = vadd.f32 %v1273_v43, %v968_v7  ;;  %v1431_v12 = vpop.f32.mrb[30].mxu0  ;;  %1456 = vmatprep.mubr.bf16.mxu1 %v1019_v5 }
 0x3fb   : > { %v980_v13 = vadd.f32 %v1431_v12, %v1273_v43  ;;  %v971_v17 = vpop.f32.mrb[31].mxu0  ;;  %1457 = vmatmul.mubr.bf16.gmra.mrb[20].mxu1 %v1020_v0  ;;  %v997_v11 = vmax.f32 %v977_v52, 0.0 }
 0x3fc   : > { %v972_v18 = vadd.f32 %v1273_v43, %v971_v17  ;;  %v995_v25 = vmax.f32 %v969_v16, 0.0 }
 0x3fd   : > { %v998_v30 = vmax.f32 %v980_v13, 0.0 }
 0x3fe   : > { %v996_v54 = vmax.f32 %v972_v18, 0.0 }
 0x3ff   : > { %v1022_v19 = vpack.c.bf16 %v998_v30, %v997_v11 }
 0x400   : > { %v1021_v27 = vpack.c.bf16 %v996_v54, %v995_v25 }
 0x402   : > { %1460 = vmatprep.mubr.bf16.mxu1 %v1021_v27 }
 0x403   : > { %1461 = vmatmul.mubr.bf16.gmra.mrb[24].mxu1 %v1022_v19 }
 0x4be   : > { %v1450_v48 = vpop.f32.mrb[32].mxu0 }
 0x4bf   : > { %v1119_v20 = vadd.f32 %v1450_v48, %v1282_v31  ;;  %v1110_v36 = vpop.f32.mrb[33].mxu0 }
 0x4c0   : > { %v1111_v37 = vadd.f32 %v1282_v31, %v1110_v36  ;;  %v1451_v1 = vpop.f32.mrb[34].mxu0 }
 0x4c1   : > { %1176 = vst.msk [vmem:[%s2039_s10 + $0x10] sm:$0xff] %vm1173_vm3, %v1119_v20  ;;  %v1122_v42 = vadd.f32 %v1451_v1, %v1282_v31  ;;  %v1113_v43 = vpop.f32.mrb[35].mxu0 }
 0x4c2   : > { %1174 = vst.msk [vmem:[%s2039_s10] sm:$0xff] %vm1173_vm3, %v1111_v37  ;;  %v1114_v49 = vadd.f32 %v1282_v31, %v1113_v43 }
 0x4c3   : > { %1177 = vst.msk [vmem:[%s2039_s10 + $0x18] sm:$0xff] %vm1173_vm3, %v1122_v42 }
 0x4c4   : > { %1175 = vst.msk [vmem:[%s2039_s10 + $0x8] sm:$0xff] %vm1173_vm3, %v1114_v49 }
 0x4c6   : > { %v1454_v23 = vpop.f32.mrb[16].mxu1 }
 0x4c7   : > { %v1135_v24 = vadd.f32 %v1454_v23, %v1282_v31  ;;  %v1126_v26 = vpop.f32.mrb[17].mxu1 }
 0x4c8   : > { %v1127_v62 = vadd.f32 %v1282_v31, %v1126_v26  ;;  %v1455_v55 = vpop.f32.mrb[18].mxu1 }
 0x4c9   : > { %1180 = vst.msk [vmem:[%s2039_s10 + $0x30] sm:$0xff] %vm1173_vm3, %v1135_v24  ;;  %v1138_v28 = vadd.f32 %v1455_v55, %v1282_v31  ;;  %v1129_v29 = vpop.f32.mrb[19].mxu1 }
 0x4ca   : > { %1178 = vst.msk [vmem:[%s2039_s10 + $0x20] sm:$0xff] %vm1173_vm3, %v1127_v62  ;;  %v1130_v2 = vadd.f32 %v1282_v31, %v1129_v29 }
 0x4cb   : > { %1181 = vst.msk [vmem:[%s2039_s10 + $0x38] sm:$0xff] %vm1173_vm3, %v1138_v28 }
 0x4cc   : > { %1179 = vst.msk [vmem:[%s2039_s10 + $0x28] sm:$0xff] %vm1173_vm3, %v1130_v2 }
 0x4ce   : > { %v1458_v4 = vpop.f32.mrb[20].mxu1 }
 0x4cf   : > { %v1151_v32 = vadd.f32 %v1458_v4, %v1282_v31  ;;  %v1142_v33 = vpop.f32.mrb[21].mxu1 }
 0x4d0   : > { %v1143_v34 = vadd.f32 %v1282_v31, %v1142_v33  ;;  %v1459_v63 = vpop.f32.mrb[22].mxu1 }
 0x4d1   : > { %1184 = vst.msk [vmem:[%s2039_s10 + $0x50] sm:$0xff] %vm1173_vm3, %v1151_v32  ;;  %v1154_v39 = vadd.f32 %v1459_v63, %v1282_v31  ;;  %v1145_v40 = vpop.f32.mrb[23].mxu1 }
 0x4d2   : > { %1182 = vst.msk [vmem:[%s2039_s10 + $0x40] sm:$0xff] %vm1173_vm3, %v1143_v34  ;;  %v1146_v21 = vadd.f32 %v1282_v31, %v1145_v40 }
 0x4d3   : > { %1185 = vst.msk [vmem:[%s2039_s10 + $0x58] sm:$0xff] %vm1173_vm3, %v1154_v39 }
 0x4d4   : > { %1183 = vst.msk [vmem:[%s2039_s10 + $0x48] sm:$0xff] %vm1173_vm3, %v1146_v21 }
 0x4d6   : > { %v1462_v41 = vpop.f32.mrb[24].mxu1 }
 0x4d7   : > { %v1167_v44 = vadd.f32 %v1462_v41, %v1282_v31  ;;  %v1158_v3 = vpop.f32.mrb[25].mxu1 }
 0x4d8   : > { %v1159_v8 = vadd.f32 %v1282_v31, %v1158_v3  ;;  %v1463_v45 = vpop.f32.mrb[26].mxu1 }
 0x4d9   : > { %1188 = vst.msk [vmem:[%s2039_s10 + $0x70] sm:$0xff] %vm1173_vm3, %v1167_v44  ;;  %v1170_v46 = vadd.f32 %v1463_v45, %v1282_v31  ;;  %v1161_v47 = vpop.f32.mrb[27].mxu1 }
 0x4da   : > { %1186 = vst.msk [vmem:[%s2039_s10 + $0x60] sm:$0xff] %vm1173_vm3, %v1159_v8  ;;  %v1162_v22 = vadd.f32 %v1282_v31, %v1161_v47 }
 0x4db   : > { %1189 = vst.msk [vmem:[%s2039_s10 + $0x78] sm:$0xff] %vm1173_vm3, %v1170_v46 }
 0x4dc   : > { %1187 = vst.msk [vmem:[%s2039_s10 + $0x68] sm:$0xff] %vm1173_vm3, %v1162_v22 }
 0x4dd PF: > { %s14_s15 = sadd.s32 1, %s1551_s15  }
 0x4de   : > { %p11_p4 = scmp.ge.s32.totalorder %s14_s15, 4  }
 0x4e0   :  { %13 = sbr.rel (!%p11_p4) target bundleno = 1 (0x1), region = 66 }

</bundles_post_ra>
